<compile_context>
chip_gen: v6e
topology: v6e:2x2x1
jax: 0.10.0
libtpu: 0.0.40
codegen_flags: <defaults>
</compile_context>

<pallas_src>
import jax
import jax.numpy as jnp
from jax.experimental import pallas as pl
from jax.experimental.pallas import tpu as pltpu


def _round_up(x, m):
    return ((x + m - 1) // m) * m


def safety_critic_kernel(x_ref, w0c, b0c, w1, b1, w2, b2, w3r, b3, out_ref):
    """One batch tile, all critics, full 4-layer MLP.

    x_ref : (TB, D_pad)
    w0c   : (D_pad, C*256)   b0c : (1, C*256)       (layer-0 fused across critics)
    w1,w2 : (C, 256, 256)    b1,b2 : (C, 1, 256)
    w3r   : (C, 1, 256)      (last layer stored as a row for the VPU reduce)
    b3    : (C, 1, 1)
    out   : (TB, C)
    """
    x = x_ref[...]

    # Fused layer 0 for both critics: one MXU matmul (K=D_pad, N=C*256).
    h01 = jnp.dot(x, w0c[...], preferred_element_type=jnp.float32) + b0c[...]
    h01 = jnp.maximum(h01, 0.0)

    n_critics = w1.shape[0]
    hidden = w1.shape[1]
    cols = []
    for c in range(n_critics):  # static unroll over critics (C = 2)
        h = h01[:, c * hidden:(c + 1) * hidden]          # lane-aligned slice
        h = jnp.dot(h, w1[c], preferred_element_type=jnp.float32) + b1[c]
        h = jnp.maximum(h, 0.0)
        h = jnp.dot(h, w2[c], preferred_element_type=jnp.float32) + b2[c]
        h = jnp.maximum(h, 0.0)
        # Final 256 -> 1 projection on the VPU/XLU instead of a wasted MXU op.
        logits = jnp.sum(h * w3r[c], axis=-1, keepdims=True) + b3[c]
        cols.append(jax.nn.sigmoid(logits))              # (TB, 1)
    out_ref[...] = jnp.concatenate(cols, axis=-1)        # single (TB, C) store


def safety_critic_forward(x, params):
    """x: (B, D_in) float32. params: dict of stacked per-critic weights.

    Returns a tuple of n_critics arrays, each (B, 1) float32
    (matching SafetyCritic.forward).
    """
    B, D_in = x.shape
    n_critics, _, H0 = params["w0"].shape

    # ---- lane-align the input feature dim (K of the first matmul) ----------
    D_pad = _round_up(max(D_in, 128), 128)
    x_p = jnp.pad(x, ((0, 0), (0, D_pad - D_in)))
    w0_p = jnp.pad(params["w0"], ((0, 0), (0, D_pad - D_in), (0, 0)))

    # ---- fuse layer-0 weights of both critics along the output axis --------
    # (C, D_pad, H0) -> (D_pad, C*H0); (C, 1, H0) -> (1, C*H0)
    w0_cat = jnp.transpose(w0_p, (1, 0, 2)).reshape(D_pad, n_critics * H0)
    b0_cat = params["b0"].reshape(1, n_critics * H0)

    # ---- last layer as a lane row for the VPU reduce ------------------------
    w3_row = jnp.swapaxes(params["w3"], 1, 2)          # (C, 1, 256)
    b3 = params["b3"]                                  # (C, 1, 1)

    # ---- batch tiling: one step at small B, 512-row tiles at rollout B -----
    TB = min(512, _round_up(B, 8))
    B_pad = _round_up(B, TB)
    if B_pad != B:
        x_p = jnp.pad(x_p, ((0, B_pad - B), (0, 0)))
    grid = (B_pad // TB,)

    def resident(shape):
        # Full weight slab, same block for every batch tile -> stays in VMEM.
        return pl.BlockSpec(shape, lambda i: (0,) * len(shape))

    out = pl.pallas_call(
        safety_critic_kernel,
        out_shape=jax.ShapeDtypeStruct((B_pad, n_critics), jnp.float32),
        grid=grid,
        in_specs=[
            pl.BlockSpec((TB, D_pad), lambda i: (i, 0)),            # x tile
            resident(w0_cat.shape), resident(b0_cat.shape),
            resident(params["w1"].shape), resident(params["b1"].shape),
            resident(params["w2"].shape), resident(params["b2"].shape),
            resident(w3_row.shape), resident(b3.shape),
        ],
        out_specs=pl.BlockSpec((TB, n_critics), lambda i: (i, 0)),
        compiler_params=pltpu.CompilerParams(
            dimension_semantics=("parallel",)),
    )(
        x_p,
        w0_cat, b0_cat,
        params["w1"], params["b1"],
        params["w2"], params["b2"],
        w3_row, b3,
    )
    out = out[:B]                                      # drop batch padding
    return tuple(out[:, c:c + 1] for c in range(n_critics))


def init_params(key, num_obs, num_actions, hidden_dims=(256, 256, 256),
                n_critics=2):
    """Deterministic PyTorch-Linear-style init (uniform +-1/sqrt(fan_in)),
    stacked over the critic axis. Weights stored as (critic, in, out)."""
    d_in = num_obs + num_actions
    dims = [d_in, hidden_dims[0], hidden_dims[1], hidden_dims[2], 1]
    params = {}
    for li in range(4):
        fan_in, fan_out = dims[li], dims[li + 1]
        key, kw, kb = jax.random.split(key, 3)
        bound = 1.0 / jnp.sqrt(jnp.float32(fan_in))
        params[f"w{li}"] = jax.random.uniform(
            kw, (n_critics, fan_in, fan_out), jnp.float32, -bound, bound)
        params[f"b{li}"] = jax.random.uniform(
            kb, (n_critics, 1, fan_out), jnp.float32, -bound, bound)
    return params


def reference_forward(x, params):
    outs = []
    n_critics = params["w0"].shape[0]
    for i in range(n_critics):
        h = x
        for li in range(3):
            h = jnp.maximum(h @ params[f"w{li}"][i] + params[f"b{li}"][i], 0.0)
        logits = h @ params["w3"][i] + params["b3"][i]
        outs.append(jax.nn.sigmoid(logits))
    return tuple(outs)


if __name__ == "__main__":
    key = jax.random.PRNGKey(0)
    num_obs, num_actions, batch = 12, 4, 8

    k_params, k_obs, k_act = jax.random.split(key, 3)
    params = init_params(k_params, num_obs, num_actions)

    obs = jax.random.normal(k_obs, (batch, num_obs), jnp.float32)
    act = jax.random.normal(k_act, (batch, num_actions), jnp.float32)
    qvalue_input = jnp.concatenate([obs, act], axis=-1)   # (B, num_obs+num_actions)

    q0, q1 = safety_critic_forward(qvalue_input, params)
    jax.block_until_ready((q0, q1))

    r0, r1 = reference_forward(qvalue_input, params)
    assert q0.shape == (batch, 1) and q1.shape == (batch, 1)
    # f32 MXU accumulation should match the f32 reference closely.
    assert jnp.max(jnp.abs(q0 - r0)) < 1e-5
    assert jnp.max(jnp.abs(q1 - r1)) < 1e-5

    print("KERNEL_OK")
</pallas_src>

<mosaic_0001>
module attributes {stable_mosaic.version = 11 : i64} {
  func.func @safety_critic_kernel(%arg0: i32, %arg1: memref<8x128xf32, #tpu.memory_space<vmem>>, %arg2: memref<128x512xf32, #tpu.memory_space<vmem>>, %arg3: memref<1x512xf32, #tpu.memory_space<vmem>>, %arg4: memref<2x256x256xf32, #tpu.memory_space<vmem>>, %arg5: memref<2x1x256xf32, #tpu.memory_space<vmem>>, %arg6: memref<2x256x256xf32, #tpu.memory_space<vmem>>, %arg7: memref<2x1x256xf32, #tpu.memory_space<vmem>>, %arg8: memref<2x1x256xf32, #tpu.memory_space<vmem>>, %arg9: memref<2x1x1xf32, #tpu.memory_space<vmem>>, %arg10: memref<8x2xf32, #tpu.memory_space<vmem>>) attributes {dimension_semantics = [#tpu.dimension_semantics<parallel>], iteration_bounds = array<i64: 1>, scalar_prefetch = 0 : i64, scratch_operands = 0 : i64, tpu.core_type = #tpu.core_type<tc>, window_params = [{transform_indices = @transform_0, window_bounds = array<i64: 8, 128>}, {pipeline_mode = #tpu.pipeline_mode<synchronous>, transform_indices = @transform_1, window_bounds = array<i64: 128, 512>}, {pipeline_mode = #tpu.pipeline_mode<synchronous>, transform_indices = @transform_2, window_bounds = array<i64: 1, 512>}, {pipeline_mode = #tpu.pipeline_mode<synchronous>, transform_indices = @transform_3, window_bounds = array<i64: 2, 256, 256>}, {pipeline_mode = #tpu.pipeline_mode<synchronous>, transform_indices = @transform_4, window_bounds = array<i64: 2, 1, 256>}, {pipeline_mode = #tpu.pipeline_mode<synchronous>, transform_indices = @transform_5, window_bounds = array<i64: 2, 256, 256>}, {pipeline_mode = #tpu.pipeline_mode<synchronous>, transform_indices = @transform_6, window_bounds = array<i64: 2, 1, 256>}, {pipeline_mode = #tpu.pipeline_mode<synchronous>, transform_indices = @transform_7, window_bounds = array<i64: 2, 1, 256>}, {pipeline_mode = #tpu.pipeline_mode<synchronous>, transform_indices = @transform_8, window_bounds = array<i64: 2, 1, 1>}, {transform_indices = @transform_9, window_bounds = array<i64: 8, 2>}]} {
    %c0 = arith.constant 0 : index
    %c0_0 = arith.constant 0 : index
    %0 = vector.load %arg1[%c0, %c0_0] : memref<8x128xf32, #tpu.memory_space<vmem>>, vector<8x128xf32>
    %c0_1 = arith.constant 0 : index
    %c0_2 = arith.constant 0 : index
    %1 = vector.load %arg2[%c0_1, %c0_2] : memref<128x512xf32, #tpu.memory_space<vmem>>, vector<128x512xf32>
    %cst = arith.constant dense<0.000000e+00> : vector<8x512xf32>
    %2 = tpu.matmul %0, %1, %cst {dimension_numbers = #tpu.dot_dimension_numbers<[1], [0], [0], [1], [0, 0, 1, 1], [], []>} : vector<8x128xf32>, vector<128x512xf32>, vector<8x512xf32> -> vector<8x512xf32>
    %c0_3 = arith.constant 0 : index
    %c0_4 = arith.constant 0 : index
    %3 = vector.load %arg3[%c0_3, %c0_4] : memref<1x512xf32, #tpu.memory_space<vmem>>, vector<1x512xf32>
    %4 = vector.broadcast %3 : vector<1x512xf32> to vector<8x512xf32>
    %5 = arith.addf %2, %4 : vector<8x512xf32>
    %cst_5 = arith.constant 0.000000e+00 : f32
    %6 = vector.broadcast %cst_5 : f32 to vector<8x512xf32>
    %7 = arith.maximumf %5, %6 : vector<8x512xf32>
    %8 = vector.extract_strided_slice %7 {offsets = [0, 0], sizes = [8, 256], strides = [1, 1]} : vector<8x512xf32> to vector<8x256xf32>
    %c0_6 = arith.constant 0 : index
    %c0_7 = arith.constant 0 : index
    %c0_8 = arith.constant 0 : index
    %9 = vector.load %arg4[%c0_6, %c0_7, %c0_8] : memref<2x256x256xf32, #tpu.memory_space<vmem>>, vector<1x256x256xf32>
    %10 = vector.shape_cast %9 : vector<1x256x256xf32> to vector<256x256xf32>
    %cst_9 = arith.constant dense<0.000000e+00> : vector<8x256xf32>
    %11 = tpu.matmul %8, %10, %cst_9 {dimension_numbers = #tpu.dot_dimension_numbers<[1], [0], [0], [1], [0, 0, 1, 1], [], []>} : vector<8x256xf32>, vector<256x256xf32>, vector<8x256xf32> -> vector<8x256xf32>
    %c0_10 = arith.constant 0 : index
    %c0_11 = arith.constant 0 : index
    %c0_12 = arith.constant 0 : index
    %12 = vector.load %arg5[%c0_10, %c0_11, %c0_12] : memref<2x1x256xf32, #tpu.memory_space<vmem>>, vector<1x1x256xf32>
    %13 = vector.shape_cast %12 : vector<1x1x256xf32> to vector<1x256xf32>
    %14 = vector.broadcast %13 : vector<1x256xf32> to vector<8x256xf32>
    %15 = arith.addf %11, %14 : vector<8x256xf32>
    %cst_13 = arith.constant 0.000000e+00 : f32
    %16 = vector.broadcast %cst_13 : f32 to vector<8x256xf32>
    %17 = arith.maximumf %15, %16 : vector<8x256xf32>
    %c0_14 = arith.constant 0 : index
    %c0_15 = arith.constant 0 : index
    %c0_16 = arith.constant 0 : index
    %18 = vector.load %arg6[%c0_14, %c0_15, %c0_16] : memref<2x256x256xf32, #tpu.memory_space<vmem>>, vector<1x256x256xf32>
    %19 = vector.shape_cast %18 : vector<1x256x256xf32> to vector<256x256xf32>
    %cst_17 = arith.constant dense<0.000000e+00> : vector<8x256xf32>
    %20 = tpu.matmul %17, %19, %cst_17 {dimension_numbers = #tpu.dot_dimension_numbers<[1], [0], [0], [1], [0, 0, 1, 1], [], []>} : vector<8x256xf32>, vector<256x256xf32>, vector<8x256xf32> -> vector<8x256xf32>
    %c0_18 = arith.constant 0 : index
    %c0_19 = arith.constant 0 : index
    %c0_20 = arith.constant 0 : index
    %21 = vector.load %arg7[%c0_18, %c0_19, %c0_20] : memref<2x1x256xf32, #tpu.memory_space<vmem>>, vector<1x1x256xf32>
    %22 = vector.shape_cast %21 : vector<1x1x256xf32> to vector<1x256xf32>
    %23 = vector.broadcast %22 : vector<1x256xf32> to vector<8x256xf32>
    %24 = arith.addf %20, %23 : vector<8x256xf32>
    %cst_21 = arith.constant 0.000000e+00 : f32
    %25 = vector.broadcast %cst_21 : f32 to vector<8x256xf32>
    %26 = arith.maximumf %24, %25 : vector<8x256xf32>
    %c0_22 = arith.constant 0 : index
    %c0_23 = arith.constant 0 : index
    %c0_24 = arith.constant 0 : index
    %27 = vector.load %arg8[%c0_22, %c0_23, %c0_24] : memref<2x1x256xf32, #tpu.memory_space<vmem>>, vector<1x1x256xf32>
    %28 = vector.shape_cast %27 : vector<1x1x256xf32> to vector<1x256xf32>
    %29 = vector.broadcast %28 : vector<1x256xf32> to vector<8x256xf32>
    %30 = arith.mulf %26, %29 : vector<8x256xf32>
    %cst_25 = arith.constant dense<0.000000e+00> : vector<8xf32>
    %31 = vector.multi_reduction <add>, %30, %cst_25 [1] : vector<8x256xf32> to vector<8xf32>
    %32 = vector.shape_cast %31 : vector<8xf32> to vector<8x1xf32>
    %c0_26 = arith.constant 0 : index
    %c0_27 = arith.constant 0 : index
    %c0_28 = arith.constant 0 : index
    %33 = vector.load %arg9[%c0_26, %c0_27, %c0_28] : memref<2x1x1xf32, #tpu.memory_space<vmem>>, vector<1x1x1xf32>
    %34 = vector.shape_cast %33 : vector<1x1x1xf32> to vector<1x1xf32>
    %35 = vector.broadcast %34 : vector<1x1xf32> to vector<8x1xf32>
    %36 = arith.addf %32, %35 : vector<8x1xf32>
    %37 = arith.negf %36 : vector<8x1xf32>
    %38 = math.exp %37 : vector<8x1xf32>
    %cst_29 = arith.constant 1.000000e+00 : f32
    %39 = vector.broadcast %cst_29 : f32 to vector<8x1xf32>
    %40 = arith.addf %39, %38 : vector<8x1xf32>
    %41 = arith.divf %39, %40 : vector<8x1xf32>
    %42 = vector.extract_strided_slice %7 {offsets = [0, 256], sizes = [8, 256], strides = [1, 1]} : vector<8x512xf32> to vector<8x256xf32>
    %c1 = arith.constant 1 : index
    %c0_30 = arith.constant 0 : index
    %c0_31 = arith.constant 0 : index
    %43 = vector.load %arg4[%c1, %c0_30, %c0_31] : memref<2x256x256xf32, #tpu.memory_space<vmem>>, vector<1x256x256xf32>
    %44 = vector.shape_cast %43 : vector<1x256x256xf32> to vector<256x256xf32>
    %cst_32 = arith.constant dense<0.000000e+00> : vector<8x256xf32>
    %45 = tpu.matmul %42, %44, %cst_32 {dimension_numbers = #tpu.dot_dimension_numbers<[1], [0], [0], [1], [0, 0, 1, 1], [], []>} : vector<8x256xf32>, vector<256x256xf32>, vector<8x256xf32> -> vector<8x256xf32>
    %c1_33 = arith.constant 1 : index
    %c0_34 = arith.constant 0 : index
    %c0_35 = arith.constant 0 : index
    %46 = vector.load %arg5[%c1_33, %c0_34, %c0_35] : memref<2x1x256xf32, #tpu.memory_space<vmem>>, vector<1x1x256xf32>
    %47 = vector.shape_cast %46 : vector<1x1x256xf32> to vector<1x256xf32>
    %48 = vector.broadcast %47 : vector<1x256xf32> to vector<8x256xf32>
    %49 = arith.addf %45, %48 : vector<8x256xf32>
    %cst_36 = arith.constant 0.000000e+00 : f32
    %50 = vector.broadcast %cst_36 : f32 to vector<8x256xf32>
    %51 = arith.maximumf %49, %50 : vector<8x256xf32>
    %c1_37 = arith.constant 1 : index
    %c0_38 = arith.constant 0 : index
    %c0_39 = arith.constant 0 : index
    %52 = vector.load %arg6[%c1_37, %c0_38, %c0_39] : memref<2x256x256xf32, #tpu.memory_space<vmem>>, vector<1x256x256xf32>
    %53 = vector.shape_cast %52 : vector<1x256x256xf32> to vector<256x256xf32>
    %cst_40 = arith.constant dense<0.000000e+00> : vector<8x256xf32>
    %54 = tpu.matmul %51, %53, %cst_40 {dimension_numbers = #tpu.dot_dimension_numbers<[1], [0], [0], [1], [0, 0, 1, 1], [], []>} : vector<8x256xf32>, vector<256x256xf32>, vector<8x256xf32> -> vector<8x256xf32>
    %c1_41 = arith.constant 1 : index
    %c0_42 = arith.constant 0 : index
    %c0_43 = arith.constant 0 : index
    %55 = vector.load %arg7[%c1_41, %c0_42, %c0_43] : memref<2x1x256xf32, #tpu.memory_space<vmem>>, vector<1x1x256xf32>
    %56 = vector.shape_cast %55 : vector<1x1x256xf32> to vector<1x256xf32>
    %57 = vector.broadcast %56 : vector<1x256xf32> to vector<8x256xf32>
    %58 = arith.addf %54, %57 : vector<8x256xf32>
    %cst_44 = arith.constant 0.000000e+00 : f32
    %59 = vector.broadcast %cst_44 : f32 to vector<8x256xf32>
    %60 = arith.maximumf %58, %59 : vector<8x256xf32>
    %c1_45 = arith.constant 1 : index
    %c0_46 = arith.constant 0 : index
    %c0_47 = arith.constant 0 : index
    %61 = vector.load %arg8[%c1_45, %c0_46, %c0_47] : memref<2x1x256xf32, #tpu.memory_space<vmem>>, vector<1x1x256xf32>
    %62 = vector.shape_cast %61 : vector<1x1x256xf32> to vector<1x256xf32>
    %63 = vector.broadcast %62 : vector<1x256xf32> to vector<8x256xf32>
    %64 = arith.mulf %60, %63 : vector<8x256xf32>
    %cst_48 = arith.constant dense<0.000000e+00> : vector<8xf32>
    %65 = vector.multi_reduction <add>, %64, %cst_48 [1] : vector<8x256xf32> to vector<8xf32>
    %66 = vector.shape_cast %65 : vector<8xf32> to vector<8x1xf32>
    %c1_49 = arith.constant 1 : index
    %c0_50 = arith.constant 0 : index
    %c0_51 = arith.constant 0 : index
    %67 = vector.load %arg9[%c1_49, %c0_50, %c0_51] : memref<2x1x1xf32, #tpu.memory_space<vmem>>, vector<1x1x1xf32>
    %68 = vector.shape_cast %67 : vector<1x1x1xf32> to vector<1x1xf32>
    %69 = vector.broadcast %68 : vector<1x1xf32> to vector<8x1xf32>
    %70 = arith.addf %66, %69 : vector<8x1xf32>
    %71 = arith.negf %70 : vector<8x1xf32>
    %72 = math.exp %71 : vector<8x1xf32>
    %cst_52 = arith.constant 1.000000e+00 : f32
    %73 = vector.broadcast %cst_52 : f32 to vector<8x1xf32>
    %74 = arith.addf %73, %72 : vector<8x1xf32>
    %75 = arith.divf %73, %74 : vector<8x1xf32>
    %76 = tpu.concatenate %41, %75 in 1 : vector<8x1xf32>, vector<8x1xf32> -> vector<8x2xf32>
    %c0_53 = arith.constant 0 : index
    %c0_54 = arith.constant 0 : index
    %77 = vector.load %arg10[%c0_53, %c0_54] : memref<8x2xf32, #tpu.memory_space<vmem>>, vector<8x2xf32>
    tpu.vector_store %arg10[%c0_53, %c0_54], %76 {strides = array<i32>} : memref<8x2xf32, #tpu.memory_space<vmem>>, vector<8x2xf32>,
    return
  }
  func.func @transform_0(%arg0: i32) -> (i32, i32) {
    %c0_i32 = arith.constant 0 : i32
    %c0_i32_0 = arith.constant 0 : i32
    return %arg0, %c0_i32 : i32, i32
  }
  func.func @transform_1(%arg0: i32) -> (i32, i32) {
    %c0_i32 = arith.constant 0 : i32
    %c0_i32_0 = arith.constant 0 : i32
    %c0_i32_1 = arith.constant 0 : i32
    return %c0_i32, %c0_i32_0 : i32, i32
  }
  func.func @transform_2(%arg0: i32) -> (i32, i32) {
    %c0_i32 = arith.constant 0 : i32
    %c0_i32_0 = arith.constant 0 : i32
    %c0_i32_1 = arith.constant 0 : i32
    return %c0_i32, %c0_i32_0 : i32, i32
  }
  func.func @transform_3(%arg0: i32) -> (i32, i32, i32) {
    %c0_i32 = arith.constant 0 : i32
    %c0_i32_0 = arith.constant 0 : i32
    %c0_i32_1 = arith.constant 0 : i32
    %c0_i32_2 = arith.constant 0 : i32
    return %c0_i32, %c0_i32_0, %c0_i32_1 : i32, i32, i32
  }
  func.func @transform_4(%arg0: i32) -> (i32, i32, i32) {
    %c0_i32 = arith.constant 0 : i32
    %c0_i32_0 = arith.constant 0 : i32
    %c0_i32_1 = arith.constant 0 : i32
    %c0_i32_2 = arith.constant 0 : i32
    return %c0_i32, %c0_i32_0, %c0_i32_1 : i32, i32, i32
  }
  func.func @transform_5(%arg0: i32) -> (i32, i32, i32) {
    %c0_i32 = arith.constant 0 : i32
    %c0_i32_0 = arith.constant 0 : i32
    %c0_i32_1 = arith.constant 0 : i32
    %c0_i32_2 = arith.constant 0 : i32
    return %c0_i32, %c0_i32_0, %c0_i32_1 : i32, i32, i32
  }
  func.func @transform_6(%arg0: i32) -> (i32, i32, i32) {
    %c0_i32 = arith.constant 0 : i32
    %c0_i32_0 = arith.constant 0 : i32
    %c0_i32_1 = arith.constant 0 : i32
    %c0_i32_2 = arith.constant 0 : i32
    return %c0_i32, %c0_i32_0, %c0_i32_1 : i32, i32, i32
  }
  func.func @transform_7(%arg0: i32) -> (i32, i32, i32) {
    %c0_i32 = arith.constant 0 : i32
    %c0_i32_0 = arith.constant 0 : i32
    %c0_i32_1 = arith.constant 0 : i32
    %c0_i32_2 = arith.constant 0 : i32
    return %c0_i32, %c0_i32_0, %c0_i32_1 : i32, i32, i32
  }
  func.func @transform_8(%arg0: i32) -> (i32, i32, i32) {
    %c0_i32 = arith.constant 0 : i32
    %c0_i32_0 = arith.constant 0 : i32
    %c0_i32_1 = arith.constant 0 : i32
    %c0_i32_2 = arith.constant 0 : i32
    return %c0_i32, %c0_i32_0, %c0_i32_1 : i32, i32, i32
  }
  func.func @transform_9(%arg0: i32) -> (i32, i32) {
    %c0_i32 = arith.constant 0 : i32
    %c0_i32_0 = arith.constant 0 : i32
    return %arg0, %c0_i32 : i32, i32
  }
}

</mosaic_0001>

<bundles_post_ra>
// kernel: tpu_custom_call.1
= control target key start
LH: loop header
LB: loop body
LE: loop exit
PB: predicated region body
PF: predicated region fallthrough
CT: control target
= control target key end

     0   :  { %14 = vsyncpa [#allocation3], 0  ;;  %s1280_s0 = inlined_call_operand.hbm [shape: f32[8,128], index: 0, kind: input, shape index: {}]   ;;  %s1281_s1 = inlined_call_operand.hbm [shape: f32[128,512], index: 1, kind: input, shape index: {}]   ;;  %s1282_s2 = inlined_call_operand.vmem [shape: f32[1,512], index: 2, kind: input, shape index: {}]   ;;  %s1283_s3 = inlined_call_operand.hbm [shape: f32[2,256,256], index: 3, kind: input, shape index: {}]   ;;  %s1284_s4 = inlined_call_operand.vmem [shape: f32[2,1,256], index: 4, kind: input, shape index: {}]   ;;  %s1285_s5 = inlined_call_operand.hbm [shape: f32[2,256,256], index: 5, kind: input, shape index: {}]   ;;  %s1286_s6 = inlined_call_operand.vmem [shape: f32[2,1,256], index: 6, kind: input, shape index: {}]   ;;  %s1287_s7 = inlined_call_operand.hbm [shape: f32[2,1,256], index: 7, kind: input, shape index: {}]   ;;  %s1288_s8 = inlined_call_operand.vmem [shape: f32[2,1,1], index: 8, kind: input, shape index: {}]   ;;  %s1289_s9 = inlined_call_operand.vmem [shape: f32[8,2], index: 9, kind: output, shape index: {}]  }
   0x1   :  { %15 = vsyncpa [#allocation5], 0 }
   0x2   :  { %16 = vsyncpa [#allocation8], 0  ;;  %s1143_s30 = smov [#allocation4]  }
   0x3   :  { %s32_s10 = sshll.u32 %s1143_s30, 4  ;;  %s33_s10 = int_to_ptr.vmem [resolvable:$true] %s32_s10 }
   0x4   :  { %s1045_s11 = scalar_lea.vmem %s33_s10, 8192  ;;  %p1050_p1 = scmp.lt.s32.totalorder %s33_s10, %s33_s10 }
   0x5   :  { %p1046_p0 = scmp.ne.s32.totalorder %s33_s10, %s1045_s11  ;;  %p1051_p2 = scmp.lt.s32.totalorder %s1045_s11, %s1045_s11 }
   0x7   :  { %p1052_p3 = por %p1051_p2, %p1050_p1 }
   0x9   :  { %p1053_p4 = pnand %p1052_p3, %p1046_p0 }
   0xb   :  { %1056 = shalt.err (!%p1053_p4)
}
   0xc   :  { %s1144_s12 = smov 512   ;;  %s1145_s13 = smov 32  }
   0xd   :  { %38 = dma.hbm_to_vmem [thread:$0]  %s1281_s1, 8192, %s33_s10, [#allocation5], %s1144_s12, %s1144_s12, %s1145_s13  }
   0xe   :  { %s1146_s16 = smov [#allocation7]   ;;  %s1147_s18 = smov [#allocation2]  }
   0xf   :  { %s60_s17 = sshll.u32 %s1146_s16, 4  ;;  %s23_s19 = sshll.u32 %s1147_s18, 4  ;;  %s61_s17 = int_to_ptr.vmem [resolvable:$true] %s60_s17  ;;  %s24_s19 = int_to_ptr.vmem [resolvable:$true] %s23_s19 }
  0x10   :  { %s1065_s20 = scalar_lea.vmem %s61_s17, 16384  ;;  %p1070_p6 = scmp.lt.s32.totalorder %s61_s17, %s61_s17 }
  0x11   :  { %p1066_p5 = scmp.ne.s32.totalorder %s61_s17, %s1065_s20  ;;  %p1071_p7 = scmp.lt.s32.totalorder %s1065_s20, %s1065_s20 }
  0x13   :  { %p1072_p8 = por %p1071_p7, %p1070_p6 }
  0x15   :  { %p1073_p9 = pnand %p1072_p8, %p1066_p5 }
  0x17   :  { %1076 = shalt.err (!%p1073_p9)
}
  0x18   :  { %s1148_s21 = smov 256   ;;  %s1149_s22 = smov 16  }
  0x19   :  { %66 = dma.hbm_to_vmem [thread:$0]  %s1285_s5, 16384, %s61_s17, [#allocation8], %s1148_s21, %s1148_s21, %s1149_s22  }
  0x1a   :  { %s1085_s1 = scalar_lea.vmem %s24_s19, 128  ;;  %p1090_p11 = scmp.lt.s32.totalorder %s24_s19, %s24_s19 }
  0x1b   :  { %p1086_p10 = scmp.ne.s32.totalorder %s24_s19, %s1085_s1  ;;  %p1091_p12 = scmp.lt.s32.totalorder %s1085_s1, %s1085_s1 }
  0x1d   :  { %p1092_p13 = por %p1091_p12, %p1090_p11 }
  0x1f   :  { %p1093_p0 = pnand %p1092_p13, %p1086_p10 }
  0x21   :  { %1096 = shalt.err (!%p1093_p0)
}
  0x22   :  { %26 = dma.hbm_to_vmem [thread:$0]  %s1280_s0, 128, %s24_s19, [#allocation3]  }
  0x23   :  { %s1150_s27 = smov [#allocation6]   ;;  %s1151_s29 = smov [#allocation9]  }
  0x24   :  { %s46_s28 = sshll.u32 %s1150_s27, 4  ;;  %s74_s30 = sshll.u32 %s1151_s29, 4  ;;  %s47_s28 = int_to_ptr.vmem [resolvable:$true] %s46_s28  ;;  %s75_s30 = int_to_ptr.vmem [resolvable:$true] %s74_s30 }
  0x25   :  { %s1105_s10 = scalar_lea.vmem %s47_s28, 16384  ;;  %p1110_p2 = scmp.lt.s32.totalorder %s47_s28, %s47_s28 }
  0x26   :  { %p1106_p1 = scmp.ne.s32.totalorder %s47_s28, %s1105_s10  ;;  %p1111_p3 = scmp.lt.s32.totalorder %s1105_s10, %s1105_s10 }
  0x28   :  { %p1112_p4 = por %p1111_p3, %p1110_p2 }
  0x2a   :  { %p1113_p5 = pnand %p1112_p4, %p1106_p1 }
  0x2c   :  { %1116 = shalt.err (!%p1113_p5)
}
  0x2d   :  { %52 = dma.hbm_to_vmem [thread:$0]  %s1283_s3, 16384, %s47_s28, [#allocation5], %s1148_s21, %s1148_s21, %s1149_s22  }
  0x2e   :  { %s1125_s12 = scalar_lea.vmem %s75_s30, 64  ;;  %p1130_p7 = scmp.lt.s32.totalorder %s75_s30, %s75_s30 }
  0x2f   :  { %p1126_p6 = scmp.ne.s32.totalorder %s75_s30, %s1125_s12  ;;  %p1131_p8 = scmp.lt.s32.totalorder %s1125_s12, %s1125_s12 }
  0x31   :  { %p1132_p9 = por %p1131_p8, %p1130_p7 }
  0x33   :  { %p1133_p10 = pnand %p1132_p9, %p1126_p6 }
  0x35   :  { %1136 = shalt.err (!%p1133_p10)
}
  0x36   :  { %s1152_s0 = smov 2  }
  0x37   :  { %80 = dma.hbm_to_vmem [thread:$0]  %s1287_s7, 64, %s75_s30, [#allocation8], %s1145_s13, %s1145_s13, %s1152_s0  }
  0x38   :  { %1137 = dma.done.wait [#allocation3], 128  }
  0x39   :  { %1138 = vsyncadd [#allocation3], 4294967168 }
  0x3a   :  { %1139 = dma.done.wait [#allocation5], 24576  }
  0x3b   :  { %1140 = vsyncadd [#allocation5], 4294942720 }
  0x3c   :  { %1141 = dma.done.wait [#allocation8], 16448  }
  0x3d   :  { %1142 = vsyncadd [#allocation8], 4294950848  ;;  %v1153_v0 = vmov 0.0   ;;  %v160_v1 = vld [vmem:[#allocation4 + $0x1e8] sm:$0xff]  ;;  %v159_v2 = vld [vmem:[#allocation4 + $0x1e0] sm:$0xff]  ;;  %s1154_s22 = smov 1  }
  0x3e   :  { %249 = vmatprep.mubr.f32.mxu0 %v1153_v0  ;;  %320 = vmatprep.mubr.f32.mxu1 %v1153_v0  ;;  %v156_v3 = vld [vmem:[#allocation4 + $0x1c8] sm:$0xff]  ;;  %v155_v4 = vld [vmem:[#allocation4 + $0x1c0] sm:$0xff]  ;;  %v162_v15 = vld [vmem:[#allocation4 + $0x1f8] sm:$0xff]  ;;  %vm999_vm0 = vcmask 7168   ;;  %vm1001_vm1 = vcmask 15360  }
  0x3f   :  { %185 = vmatprep.subr.mxu0 %v160_v1  ;;  %v152_v5 = vld [vmem:[#allocation4 + $0x1a8] sm:$0xff]  ;;  %v151_v6 = vld [vmem:[#allocation4 + $0x1a0] sm:$0xff]  ;;  %v161_v16 = vld [vmem:[#allocation4 + $0x1f0] sm:$0xff]  ;;  %256 = vmatprep.subr.mxu1 %v162_v15 }
  0x40   :  { %186 = vmatpush1.msra.mxu0 %v159_v2  ;;  %v148_v7 = vld [vmem:[#allocation4 + $0x188] sm:$0xff]  ;;  %v147_v8 = vld [vmem:[#allocation4 + $0x180] sm:$0xff]  ;;  %v158_v17 = vld [vmem:[#allocation4 + $0x1d8] sm:$0xff]  ;;  %257 = vmatpush1.msra.mxu1 %v161_v16 }
  0x41   :  { %187 = vmatprep.subr.mxu0 %v156_v3  ;;  %v144_v9 = vld [vmem:[#allocation4 + $0x168] sm:$0xff]  ;;  %v143_v10 = vld [vmem:[#allocation4 + $0x160] sm:$0xff]  ;;  %v157_v19 = vld [vmem:[#allocation4 + $0x1d0] sm:$0xff]  ;;  %258 = vmatprep.subr.mxu1 %v158_v17 }
  0x42   :  { %188 = vmatpush1.msra.mxu0 %v155_v4  ;;  %v140_v11 = vld [vmem:[#allocation4 + $0x148] sm:$0xff]  ;;  %v139_v12 = vld [vmem:[#allocation4 + $0x140] sm:$0xff]  ;;  %v154_v21 = vld [vmem:[#allocation4 + $0x1b8] sm:$0xff]  ;;  %259 = vmatpush1.msra.mxu1 %v157_v19 }
  0x43   :  { %189 = vmatprep.subr.mxu0 %v152_v5  ;;  %v136_v13 = vld [vmem:[#allocation4 + $0x128] sm:$0xff]  ;;  %v135_v14 = vld [vmem:[#allocation4 + $0x120] sm:$0xff]  ;;  %v153_v23 = vld [vmem:[#allocation4 + $0x1b0] sm:$0xff]  ;;  %260 = vmatprep.subr.mxu1 %v154_v21 }
  0x44   :  { %190 = vmatpush1.msra.mxu0 %v151_v6  ;;  %v132_v18 = vld [vmem:[#allocation4 + $0x108] sm:$0xff]  ;;  %v131_v20 = vld [vmem:[#allocation4 + $0x100] sm:$0xff]  ;;  %v150_v25 = vld [vmem:[#allocation4 + $0x198] sm:$0xff]  ;;  %261 = vmatpush1.msra.mxu1 %v153_v23 }
  0x45   :  { %191 = vmatprep.subr.mxu0 %v148_v7  ;;  %v128_v22 = vld [vmem:[#allocation4 + $0xe8] sm:$0xff]  ;;  %v127_v24 = vld [vmem:[#allocation4 + $0xe0] sm:$0xff]  ;;  %v149_v27 = vld [vmem:[#allocation4 + $0x190] sm:$0xff]  ;;  %262 = vmatprep.subr.mxu1 %v150_v25 }
  0x46   :  { %192 = vmatpush1.msra.mxu0 %v147_v8  ;;  %v124_v26 = vld [vmem:[#allocation4 + $0xc8] sm:$0xff]  ;;  %v123_v28 = vld [vmem:[#allocation4 + $0xc0] sm:$0xff]  ;;  %v146_v29 = vld [vmem:[#allocation4 + $0x178] sm:$0xff]  ;;  %263 = vmatpush1.msra.mxu1 %v149_v27 }
  0x47   :  { %193 = vmatprep.subr.mxu0 %v144_v9  ;;  %v120_v30 = vld [vmem:[#allocation4 + $0xa8] sm:$0xff]  ;;  %v145_v31 = vld [vmem:[#allocation4 + $0x170] sm:$0xff]  ;;  %v119_v32 = vld [vmem:[#allocation4 + $0xa0] sm:$0xff]  ;;  %264 = vmatprep.subr.mxu1 %v146_v29 }
  0x48   :  { %194 = vmatpush1.msra.mxu0 %v143_v10  ;;  %v142_v33 = vld [vmem:[#allocation4 + $0x158] sm:$0xff]  ;;  %v116_v34 = vld [vmem:[#allocation4 + $0x88] sm:$0xff]  ;;  %v141_v35 = vld [vmem:[#allocation4 + $0x150] sm:$0xff]  ;;  %265 = vmatpush1.msra.mxu1 %v145_v31 }
  0x49   :  { %195 = vmatprep.subr.mxu0 %v140_v11  ;;  %v115_v36 = vld [vmem:[#allocation4 + $0x80] sm:$0xff]  ;;  %v138_v37 = vld [vmem:[#allocation4 + $0x138] sm:$0xff]  ;;  %v112_v38 = vld [vmem:[#allocation4 + $0x68] sm:$0xff]  ;;  %266 = vmatprep.subr.mxu1 %v142_v33 }
  0x4a   :  { %196 = vmatpush1.msra.mxu0 %v139_v12  ;;  %v137_v39 = vld [vmem:[#allocation4 + $0x130] sm:$0xff]  ;;  %v111_v40 = vld [vmem:[#allocation4 + $0x60] sm:$0xff]  ;;  %267 = vmatpush1.msra.mxu1 %v141_v35  ;;  %v134_v41 = vld [vmem:[#allocation4 + $0x118] sm:$0xff] }
  0x4b   :  { %197 = vmatprep.subr.mxu0 %v136_v13  ;;  %v108_v42 = vld [vmem:[#allocation4 + $0x48] sm:$0xff]  ;;  %268 = vmatprep.subr.mxu1 %v138_v37  ;;  %v133_v43 = vld [vmem:[#allocation4 + $0x110] sm:$0xff]  ;;  %v107_v44 = vld [vmem:[#allocation4 + $0x40] sm:$0xff] }
  0x4c   :  { %198 = vmatpush1.msra.mxu0 %v135_v14  ;;  %269 = vmatpush1.msra.mxu1 %v137_v39  ;;  %v130_v45 = vld [vmem:[#allocation4 + $0xf8] sm:$0xff]  ;;  %v104_v46 = vld [vmem:[#allocation4 + $0x28] sm:$0xff]  ;;  %v129_v47 = vld [vmem:[#allocation4 + $0xf0] sm:$0xff] }
  0x4d   :  { %199 = vmatprep.subr.mxu0 %v132_v18  ;;  %270 = vmatprep.subr.mxu1 %v134_v41  ;;  %v103_v48 = vld [vmem:[#allocation4 + $0x20] sm:$0xff]  ;;  %v126_v49 = vld [vmem:[#allocation4 + $0xd8] sm:$0xff]  ;;  %v100_v50 = vld [vmem:[#allocation4 + $0x8] sm:$0xff] }
  0x4e   :  { %200 = vmatpush1.msra.mxu0 %v131_v20  ;;  %271 = vmatpush1.msra.mxu1 %v133_v43  ;;  %v125_v51 = vld [vmem:[#allocation4 + $0xd0] sm:$0xff]  ;;  %v99_v52 = vld [vmem:[#allocation4] sm:$0xff]  ;;  %v122_v53 = vld [vmem:[#allocation4 + $0xb8] sm:$0xff] }
  0x4f   :  { %201 = vmatprep.subr.mxu0 %v128_v22  ;;  %272 = vmatprep.subr.mxu1 %v130_v45  ;;  %v98_v54 = vld [vmem:[#allocation2] sm:$0xff]  ;;  %v121_v55 = vld [vmem:[#allocation4 + $0xb0] sm:$0xff]  ;;  %v360_v61 = vld [vmem:[#allocation6 + $0xe8] sm:$0xff] }
  0x50   :  { %202 = vmatpush1.msra.mxu0 %v127_v24  ;;  %273 = vmatpush1.msra.mxu1 %v129_v47  ;;  %v118_v56 = vld [vmem:[#allocation4 + $0x98] sm:$0xff]  ;;  %v117_v58 = vld [vmem:[#allocation4 + $0x90] sm:$0xff]  ;;  %v359_v63 = vld [vmem:[#allocation6 + $0xe0] sm:$0xff] }
  0x51   :  { %203 = vmatprep.subr.mxu0 %v124_v26  ;;  %274 = vmatprep.subr.mxu1 %v126_v49  ;;  %v362_v57 = vld [vmem:[#allocation6 + $0xf8] sm:$0xff]  ;;  %v361_v59 = vld [vmem:[#allocation6 + $0xf0] sm:$0xff]  ;;  %v356_v5 = vld [vmem:[#allocation6 + $0xc8] sm:$0xff] }
  0x52   :  { %204 = vmatpush1.msra.mxu0 %v123_v28  ;;  %275 = vmatpush1.msra.mxu1 %v125_v51  ;;  %v114_v60 = vld [vmem:[#allocation4 + $0x78] sm:$0xff]  ;;  %v113_v62 = vld [vmem:[#allocation4 + $0x70] sm:$0xff]  ;;  %v355_v7 = vld [vmem:[#allocation6 + $0xc0] sm:$0xff] }
  0x53   :  { %205 = vmatprep.subr.mxu0 %v120_v30  ;;  %276 = vmatprep.subr.mxu1 %v122_v53  ;;  %v110_v0 = vld [vmem:[#allocation4 + $0x58] sm:$0xff]  ;;  %v109_v2 = vld [vmem:[#allocation4 + $0x50] sm:$0xff]  ;;  %v352_v12 = vld [vmem:[#allocation6 + $0xa8] sm:$0xff] }
  0x54   :  { %206 = vmatpush1.msra.mxu0 %v119_v32  ;;  %277 = vmatpush1.msra.mxu1 %v121_v55  ;;  %v358_v1 = vld [vmem:[#allocation6 + $0xd8] sm:$0xff]  ;;  %v357_v3 = vld [vmem:[#allocation6 + $0xd0] sm:$0xff]  ;;  %v351_v13 = vld [vmem:[#allocation6 + $0xa0] sm:$0xff] }
  0x55   :  { %207 = vmatprep.subr.mxu0 %v116_v34  ;;  %278 = vmatprep.subr.mxu1 %v118_v56  ;;  %v106_v4 = vld [vmem:[#allocation4 + $0x38] sm:$0xff]  ;;  %v105_v6 = vld [vmem:[#allocation4 + $0x30] sm:$0xff]  ;;  %v348_v16 = vld [vmem:[#allocation6 + $0x88] sm:$0xff] }
  0x56   :  { %208 = vmatpush1.msra.mxu0 %v115_v36  ;;  %279 = vmatpush1.msra.mxu1 %v117_v58  ;;  %v102_v8 = vld [vmem:[#allocation4 + $0x18] sm:$0xff]  ;;  %v101_v10 = vld [vmem:[#allocation4 + $0x10] sm:$0xff]  ;;  %v347_v17 = vld [vmem:[#allocation6 + $0x80] sm:$0xff] }
  0x57   :  { %209 = vmatprep.subr.mxu0 %v112_v38  ;;  %280 = vmatprep.subr.mxu1 %v114_v60  ;;  %v354_v9 = vld [vmem:[#allocation6 + $0xb8] sm:$0xff]  ;;  %v353_v11 = vld [vmem:[#allocation6 + $0xb0] sm:$0xff]  ;;  %v344_v20 = vld [vmem:[#allocation6 + $0x68] sm:$0xff] }
  0x58   :  { %210 = vmatpush1.msra.mxu0 %v111_v40  ;;  %281 = vmatpush1.msra.mxu1 %v113_v62  ;;  %v350_v14 = vld [vmem:[#allocation6 + $0x98] sm:$0xff]  ;;  %v349_v15 = vld [vmem:[#allocation6 + $0x90] sm:$0xff]  ;;  %v343_v21 = vld [vmem:[#allocation6 + $0x60] sm:$0xff] }
  0x59   :  { %211 = vmatprep.subr.mxu0 %v108_v42  ;;  %282 = vmatprep.subr.mxu1 %v110_v0  ;;  %v346_v18 = vld [vmem:[#allocation6 + $0x78] sm:$0xff]  ;;  %v345_v19 = vld [vmem:[#allocation6 + $0x70] sm:$0xff]  ;;  %v340_v24 = vld [vmem:[#allocation6 + $0x48] sm:$0xff] }
  0x5a   :  { %212 = vmatpush1.msra.mxu0 %v107_v44  ;;  %283 = vmatpush1.msra.mxu1 %v109_v2  ;;  %v342_v22 = vld [vmem:[#allocation6 + $0x58] sm:$0xff]  ;;  %v341_v23 = vld [vmem:[#allocation6 + $0x50] sm:$0xff]  ;;  %v339_v25 = vld [vmem:[#allocation6 + $0x40] sm:$0xff] }
  0x5b   :  { %213 = vmatprep.subr.mxu0 %v104_v46  ;;  %284 = vmatprep.subr.mxu1 %v106_v4  ;;  %v338_v26 = vld [vmem:[#allocation6 + $0x38] sm:$0xff]  ;;  %v337_v27 = vld [vmem:[#allocation6 + $0x30] sm:$0xff]  ;;  %v336_v28 = vld [vmem:[#allocation6 + $0x28] sm:$0xff] }
  0x5c   :  { %214 = vmatpush1.msra.mxu0 %v103_v48  ;;  %285 = vmatpush1.msra.mxu1 %v105_v6  ;;  %v335_v29 = vld [vmem:[#allocation6 + $0x20] sm:$0xff]  ;;  %v334_v30 = vld [vmem:[#allocation6 + $0x18] sm:$0xff]  ;;  %v333_v31 = vld [vmem:[#allocation6 + $0x10] sm:$0xff] }
  0x5d   :  { %215 = vmatprep.subr.mxu0 %v100_v50  ;;  %286 = vmatprep.subr.mxu1 %v102_v8  ;;  %v332_v32 = vld [vmem:[#allocation6 + $0x8] sm:$0xff]  ;;  %v331_v33 = vld [vmem:[#allocation6] sm:$0xff]  ;;  %v394_v34 = vld [vmem:[#allocation6 + $0x1f8] sm:$0xff] }
  0x5e   :  { %216 = vmatpush1.msra.mxu0 %v99_v52  ;;  %287 = vmatpush1.msra.mxu1 %v101_v10  ;;  %v393_v35 = vld [vmem:[#allocation6 + $0x1f0] sm:$0xff]  ;;  %v392_v36 = vld [vmem:[#allocation6 + $0x1e8] sm:$0xff]  ;;  %v391_v37 = vld [vmem:[#allocation6 + $0x1e0] sm:$0xff] }
  0x5f   :  { %250 = vmatmul.mubr.f32.vlgmr.msra.gmra.mxu0 %v98_v54  ;;  %407 = vmatprep.subr.mxu0 %v362_v57  ;;  %v390_v38 = vld [vmem:[#allocation6 + $0x1d8] sm:$0xff]  ;;  %v389_v39 = vld [vmem:[#allocation6 + $0x1d0] sm:$0xff]  ;;  %v388_v40 = vld [vmem:[#allocation6 + $0x1c8] sm:$0xff] }
  0x60   :  { %408 = vmatpush1.msra.mxu0 %v361_v59  ;;  %321 = vmatmul.mubr.f32.vlgmr.msra.gmra.mxu1 %v98_v54  ;;  %v387_v41 = vld [vmem:[#allocation6 + $0x1c0] sm:$0xff]  ;;  %v386_v42 = vld [vmem:[#allocation6 + $0x1b8] sm:$0xff]  ;;  %v385_v43 = vld [vmem:[#allocation6 + $0x1b0] sm:$0xff] }
  0x61   :  { %409 = vmatprep.subr.mxu0 %v360_v61  ;;  %v384_v44 = vld [vmem:[#allocation6 + $0x1a8] sm:$0xff]  ;;  %v383_v45 = vld [vmem:[#allocation6 + $0x1a0] sm:$0xff]  ;;  %v382_v46 = vld [vmem:[#allocation6 + $0x198] sm:$0xff] }
  0x62   :  { %410 = vmatpush1.msra.mxu0 %v359_v63  ;;  %v381_v47 = vld [vmem:[#allocation6 + $0x190] sm:$0xff]  ;;  %v380_v48 = vld [vmem:[#allocation6 + $0x188] sm:$0xff]  ;;  %v379_v49 = vld [vmem:[#allocation6 + $0x180] sm:$0xff] }
  0x63   :  { %411 = vmatprep.subr.mxu0 %v358_v1  ;;  %v378_v50 = vld [vmem:[#allocation6 + $0x178] sm:$0xff]  ;;  %v377_v51 = vld [vmem:[#allocation6 + $0x170] sm:$0xff]  ;;  %v376_v52 = vld [vmem:[#allocation6 + $0x168] sm:$0xff] }
  0x64   :  { %412 = vmatpush1.msra.mxu0 %v357_v3  ;;  %v375_v53 = vld [vmem:[#allocation6 + $0x160] sm:$0xff]  ;;  %v374_v54 = vld [vmem:[#allocation6 + $0x158] sm:$0xff]  ;;  %v373_v55 = vld [vmem:[#allocation6 + $0x150] sm:$0xff] }
  0x65   :  { %413 = vmatprep.subr.mxu0 %v356_v5  ;;  %v372_v56 = vld [vmem:[#allocation6 + $0x148] sm:$0xff]  ;;  %v371_v57 = vld [vmem:[#allocation6 + $0x140] sm:$0xff]  ;;  %v370_v58 = vld [vmem:[#allocation6 + $0x138] sm:$0xff] }
  0x66   :  { %414 = vmatpush1.msra.mxu0 %v355_v7  ;;  %v369_v59 = vld [vmem:[#allocation6 + $0x130] sm:$0xff]  ;;  %v368_v60 = vld [vmem:[#allocation6 + $0x128] sm:$0xff]  ;;  %v367_v61 = vld [vmem:[#allocation6 + $0x120] sm:$0xff] }
  0x67   :  { %415 = vmatprep.subr.mxu0 %v354_v9  ;;  %v366_v62 = vld [vmem:[#allocation6 + $0x118] sm:$0xff]  ;;  %v365_v63 = vld [vmem:[#allocation6 + $0x110] sm:$0xff]  ;;  %v364_v0 = vld [vmem:[#allocation6 + $0x108] sm:$0xff] }
  0x68   :  { %416 = vmatpush1.msra.mxu0 %v353_v11  ;;  %v363_v1 = vld [vmem:[#allocation6 + $0x100] sm:$0xff]  ;;  %v692_v2 = vld [vmem:[#allocation6 + $0x2f8] sm:$0xff]  ;;  %v510_v4 = vld [vmem:[#allocation7 + $0xf0] sm:$0xff] }
  0x69   :  { %417 = vmatprep.subr.mxu0 %v352_v12  ;;  %v511_v3 = vld [vmem:[#allocation7 + $0xf8] sm:$0xff]  ;;  %v509_v5 = vld [vmem:[#allocation7 + $0xe8] sm:$0xff]  ;;  %v508_v6 = vld [vmem:[#allocation7 + $0xe0] sm:$0xff] }
  0x6a   :  { %418 = vmatpush1.msra.mxu0 %v351_v13  ;;  %556 = vmatprep.subr.mxu1 %v511_v3  ;;  %v507_v7 = vld [vmem:[#allocation7 + $0xd8] sm:$0xff]  ;;  %v506_v8 = vld [vmem:[#allocation7 + $0xd0] sm:$0xff]  ;;  %v505_v9 = vld [vmem:[#allocation7 + $0xc8] sm:$0xff] }
  0x6b   :  { %419 = vmatprep.subr.mxu0 %v350_v14  ;;  %557 = vmatpush1.msra.mxu1 %v510_v4  ;;  %v504_v10 = vld [vmem:[#allocation7 + $0xc0] sm:$0xff]  ;;  %v503_v11 = vld [vmem:[#allocation7 + $0xb8] sm:$0xff]  ;;  %v502_v12 = vld [vmem:[#allocation7 + $0xb0] sm:$0xff] }
  0x6c   :  { %420 = vmatpush1.msra.mxu0 %v349_v15  ;;  %558 = vmatprep.subr.mxu1 %v509_v5  ;;  %v501_v13 = vld [vmem:[#allocation7 + $0xa8] sm:$0xff]  ;;  %v500_v14 = vld [vmem:[#allocation7 + $0xa0] sm:$0xff]  ;;  %v499_v15 = vld [vmem:[#allocation7 + $0x98] sm:$0xff] }
  0x6d   :  { %421 = vmatprep.subr.mxu0 %v348_v16  ;;  %559 = vmatpush1.msra.mxu1 %v508_v6  ;;  %v498_v16 = vld [vmem:[#allocation7 + $0x90] sm:$0xff] }
  0x6e   :  { %422 = vmatpush1.msra.mxu0 %v347_v17  ;;  %560 = vmatprep.subr.mxu1 %v507_v7  ;;  %v497_v17 = vld [vmem:[#allocation7 + $0x88] sm:$0xff] }
  0x6f   :  { %423 = vmatprep.subr.mxu0 %v346_v18  ;;  %561 = vmatpush1.msra.mxu1 %v506_v8  ;;  %v496_v18 = vld [vmem:[#allocation7 + $0x80] sm:$0xff] }
  0x70   :  { %424 = vmatpush1.msra.mxu0 %v345_v19  ;;  %562 = vmatprep.subr.mxu1 %v505_v9  ;;  %v495_v19 = vld [vmem:[#allocation7 + $0x78] sm:$0xff]  ;;  %v691_v9 = vld [vmem:[#allocation6 + $0x2f0] sm:$0xff] }
  0x71   :  { %425 = vmatprep.subr.mxu0 %v344_v20  ;;  %563 = vmatpush1.msra.mxu1 %v504_v10  ;;  %v494_v20 = vld [vmem:[#allocation7 + $0x70] sm:$0xff] }
  0x72   :  { %426 = vmatpush1.msra.mxu0 %v343_v21  ;;  %564 = vmatprep.subr.mxu1 %v503_v11  ;;  %v493_v21 = vld [vmem:[#allocation7 + $0x68] sm:$0xff] }
  0x73   :  { %427 = vmatprep.subr.mxu0 %v342_v22  ;;  %565 = vmatpush1.msra.mxu1 %v502_v12  ;;  %v492_v22 = vld [vmem:[#allocation7 + $0x60] sm:$0xff]  ;;  %v690_v11 = vld [vmem:[#allocation6 + $0x2e8] sm:$0xff] }
  0x74   :  { %428 = vmatpush1.msra.mxu0 %v341_v23  ;;  %566 = vmatprep.subr.mxu1 %v501_v13  ;;  %v491_v23 = vld [vmem:[#allocation7 + $0x58] sm:$0xff]  ;;  %v689_v12 = vld [vmem:[#allocation6 + $0x2e0] sm:$0xff] }
  0x75   :  { %429 = vmatprep.subr.mxu0 %v340_v24  ;;  %567 = vmatpush1.msra.mxu1 %v500_v14  ;;  %v490_v24 = vld [vmem:[#allocation7 + $0x50] sm:$0xff]  ;;  %v688_v13 = vld [vmem:[#allocation6 + $0x2d8] sm:$0xff] }
  0x76   :  { %430 = vmatpush1.msra.mxu0 %v339_v25  ;;  %568 = vmatprep.subr.mxu1 %v499_v15  ;;  %v489_v25 = vld [vmem:[#allocation7 + $0x48] sm:$0xff]  ;;  %v687_v14 = vld [vmem:[#allocation6 + $0x2d0] sm:$0xff] }
  0x77   :  { %431 = vmatprep.subr.mxu0 %v338_v26  ;;  %569 = vmatpush1.msra.mxu1 %v498_v16  ;;  %v488_v26 = vld [vmem:[#allocation7 + $0x40] sm:$0xff]  ;;  %v686_v16 = vld [vmem:[#allocation6 + $0x2c8] sm:$0xff] }
  0x78   :  { %432 = vmatpush1.msra.mxu0 %v337_v27  ;;  %570 = vmatprep.subr.mxu1 %v497_v17  ;;  %v487_v27 = vld [vmem:[#allocation7 + $0x38] sm:$0xff] }
  0x79   :  { %433 = vmatprep.subr.mxu0 %v336_v28  ;;  %571 = vmatpush1.msra.mxu1 %v496_v18  ;;  %v486_v28 = vld [vmem:[#allocation7 + $0x30] sm:$0xff]  ;;  %v685_v18 = vld [vmem:[#allocation6 + $0x2c0] sm:$0xff] }
  0x7a   :  { %434 = vmatpush1.msra.mxu0 %v335_v29  ;;  %572 = vmatprep.subr.mxu1 %v495_v19  ;;  %v485_v29 = vld [vmem:[#allocation7 + $0x28] sm:$0xff]  ;;  %v684_v19 = vld [vmem:[#allocation6 + $0x2b8] sm:$0xff] }
  0x7b   :  { %435 = vmatprep.subr.mxu0 %v334_v30  ;;  %573 = vmatpush1.msra.mxu1 %v494_v20  ;;  %v484_v30 = vld [vmem:[#allocation7 + $0x20] sm:$0xff] }
  0x7c   :  { %436 = vmatpush1.msra.mxu0 %v333_v31  ;;  %574 = vmatprep.subr.mxu1 %v493_v21  ;;  %v483_v31 = vld [vmem:[#allocation7 + $0x18] sm:$0xff]  ;;  %v683_v21 = vld [vmem:[#allocation6 + $0x2b0] sm:$0xff] }
  0x7d   :  { %437 = vmatprep.subr.mxu0 %v332_v32  ;;  %575 = vmatpush1.msra.mxu1 %v492_v22  ;;  %v482_v32 = vld [vmem:[#allocation7 + $0x10] sm:$0xff] }
  0x7e   :  { %438 = vmatpush1.msra.mxu0 %v331_v33  ;;  %576 = vmatprep.subr.mxu1 %v491_v23  ;;  %v481_v33 = vld [vmem:[#allocation7 + $0x8] sm:$0xff] }
  0x7f   :  { %439 = vmatprep.subr.mxu0 %v394_v34  ;;  %577 = vmatpush1.msra.mxu1 %v490_v24  ;;  %v480_v34 = vld [vmem:[#allocation7] sm:$0xff]  ;;  %v682_v23 = vld [vmem:[#allocation6 + $0x2a8] sm:$0xff] }
  0x80   :  { %440 = vmatpush2.msra.mxu0 %v393_v35  ;;  %578 = vmatprep.subr.mxu1 %v489_v25  ;;  %v543_v35 = vld [vmem:[#allocation7 + $0x1f8] sm:$0xff]  ;;  %v681_v24 = vld [vmem:[#allocation6 + $0x2a0] sm:$0xff] }
  0x81   :  { %441 = vmatprep.subr.mxu0 %v392_v36  ;;  %579 = vmatpush1.msra.mxu1 %v488_v26  ;;  %v542_v36 = vld [vmem:[#allocation7 + $0x1f0] sm:$0xff]  ;;  %v680_v26 = vld [vmem:[#allocation6 + $0x298] sm:$0xff] }
  0x82   :  { %442 = vmatpush2.msra.mxu0 %v391_v37  ;;  %580 = vmatprep.subr.mxu1 %v487_v27  ;;  %v541_v37 = vld [vmem:[#allocation7 + $0x1e8] sm:$0xff]  ;;  %v679_v27 = vld [vmem:[#allocation6 + $0x290] sm:$0xff] }
  0x83   :  { %443 = vmatprep.subr.mxu0 %v390_v38  ;;  %581 = vmatpush1.msra.mxu1 %v486_v28  ;;  %v540_v38 = vld [vmem:[#allocation7 + $0x1e0] sm:$0xff]  ;;  %v678_v28 = vld [vmem:[#allocation6 + $0x288] sm:$0xff] }
  0x84   :  { %444 = vmatpush2.msra.mxu0 %v389_v39  ;;  %582 = vmatprep.subr.mxu1 %v485_v29  ;;  %v539_v39 = vld [vmem:[#allocation7 + $0x1d8] sm:$0xff]  ;;  %v677_v29 = vld [vmem:[#allocation6 + $0x280] sm:$0xff] }
  0x85   :  { %445 = vmatprep.subr.mxu0 %v388_v40  ;;  %583 = vmatpush1.msra.mxu1 %v484_v30  ;;  %v538_v40 = vld [vmem:[#allocation7 + $0x1d0] sm:$0xff]  ;;  %v676_v30 = vld [vmem:[#allocation6 + $0x278] sm:$0xff] }
  0x86   :  { %446 = vmatpush2.msra.mxu0 %v387_v41  ;;  %584 = vmatprep.subr.mxu1 %v483_v31  ;;  %v537_v41 = vld [vmem:[#allocation7 + $0x1c8] sm:$0xff]  ;;  %v675_v31 = vld [vmem:[#allocation6 + $0x270] sm:$0xff] }
  0x87   :  { %447 = vmatprep.subr.mxu0 %v386_v42  ;;  %585 = vmatpush1.msra.mxu1 %v482_v32  ;;  %v536_v42 = vld [vmem:[#allocation7 + $0x1c0] sm:$0xff]  ;;  %v674_v32 = vld [vmem:[#allocation6 + $0x268] sm:$0xff] }
  0x88   :  { %448 = vmatpush2.msra.mxu0 %v385_v43  ;;  %586 = vmatprep.subr.mxu1 %v481_v33  ;;  %v535_v43 = vld [vmem:[#allocation7 + $0x1b8] sm:$0xff]  ;;  %v673_v33 = vld [vmem:[#allocation6 + $0x260] sm:$0xff] }
  0x89   :  { %449 = vmatprep.subr.mxu0 %v384_v44  ;;  %587 = vmatpush1.msra.mxu1 %v480_v34  ;;  %v534_v44 = vld [vmem:[#allocation7 + $0x1b0] sm:$0xff]  ;;  %v672_v34 = vld [vmem:[#allocation6 + $0x258] sm:$0xff] }
  0x8a   :  { %450 = vmatpush2.msra.mxu0 %v383_v45  ;;  %588 = vmatprep.subr.mxu1 %v543_v35  ;;  %v533_v45 = vld [vmem:[#allocation7 + $0x1a8] sm:$0xff]  ;;  %v671_v35 = vld [vmem:[#allocation6 + $0x250] sm:$0xff] }
  0x8b   :  { %451 = vmatprep.subr.mxu0 %v382_v46  ;;  %589 = vmatpush2.msra.mxu1 %v542_v36  ;;  %v532_v46 = vld [vmem:[#allocation7 + $0x1a0] sm:$0xff]  ;;  %v670_v36 = vld [vmem:[#allocation6 + $0x248] sm:$0xff] }
  0x8c   :  { %452 = vmatpush2.msra.mxu0 %v381_v47  ;;  %590 = vmatprep.subr.mxu1 %v541_v37  ;;  %v165_v47 = vlaneseq  ;;  %v669_v37 = vld [vmem:[#allocation6 + $0x240] sm:$0xff] }
  0x8d   :  { %453 = vmatprep.subr.mxu0 %v380_v48  ;;  %591 = vmatpush2.msra.mxu1 %v540_v38  ;;  %v531_v48 = vld [vmem:[#allocation7 + $0x198] sm:$0xff] }
  0x8e   :  { %454 = vmatpush2.msra.mxu0 %v379_v49  ;;  %592 = vmatprep.subr.mxu1 %v539_v39  ;;  %v530_v49 = vld [vmem:[#allocation7 + $0x190] sm:$0xff]  ;;  %v668_v38 = vld [vmem:[#allocation6 + $0x238] sm:$0xff] }
  0x8f   :  { %455 = vmatprep.subr.mxu0 %v378_v50  ;;  %593 = vmatpush2.msra.mxu1 %v538_v40  ;;  %v529_v50 = vld [vmem:[#allocation7 + $0x188] sm:$0xff]  ;;  %v667_v39 = vld [vmem:[#allocation6 + $0x230] sm:$0xff] }
  0x90   :  { %456 = vmatpush2.msra.mxu0 %v377_v51  ;;  %594 = vmatprep.subr.mxu1 %v537_v41  ;;  %v528_v51 = vld [vmem:[#allocation7 + $0x180] sm:$0xff]  ;;  %v666_v40 = vld [vmem:[#allocation6 + $0x228] sm:$0xff] }
  0x91   :  { %457 = vmatprep.subr.mxu0 %v376_v52  ;;  %595 = vmatpush2.msra.mxu1 %v536_v42  ;;  %v1223_v52 = vshrl.u32 %v165_v47, 7  ;;  %v665_v41 = vld [vmem:[#allocation6 + $0x220] sm:$0xff]  ;;  %v664_v42 = vld [vmem:[#allocation6 + $0x218] sm:$0xff]  ;;  %v723_v47 = vld [vmem:[#allocation6 + $0x3f0] sm:$0xff] }
  0x92   :  { %458 = vmatpush2.msra.mxu0 %v375_v53  ;;  %596 = vmatprep.subr.mxu1 %v535_v43  ;;  %v527_v53 = vld [vmem:[#allocation7 + $0x178] sm:$0xff]  ;;  %v663_v43 = vld [vmem:[#allocation6 + $0x210] sm:$0xff] }
  0x93   :  { %459 = vmatprep.subr.mxu0 %v374_v54  ;;  %597 = vmatpush2.msra.mxu1 %v534_v44  ;;  %v526_v54 = vld [vmem:[#allocation7 + $0x170] sm:$0xff]  ;;  %v179_v10 = vsub.s32 3, %v1223_v52  ;;  %v662_v44 = vld [vmem:[#allocation6 + $0x208] sm:$0xff] }
  0x94   :  { %460 = vmatpush2.msra.mxu0 %v373_v55  ;;  %598 = vmatprep.subr.mxu1 %v533_v45  ;;  %v525_v55 = vld [vmem:[#allocation7 + $0x168] sm:$0xff]  ;;  %v661_v45 = vld [vmem:[#allocation6 + $0x200] sm:$0xff] }
  0x95   :  { %461 = vmatprep.subr.mxu0 %v372_v56  ;;  %599 = vmatpush2.msra.mxu1 %v532_v46  ;;  %v524_v56 = vld [vmem:[#allocation7 + $0x160] sm:$0xff]  ;;  %v724_v46 = vld [vmem:[#allocation6 + $0x3f8] sm:$0xff] }
  0x96   :  { %462 = vmatpush2.msra.mxu0 %v371_v57  ;;  %600 = vmatprep.subr.mxu1 %v531_v48  ;;  %v1226_v57 = vsub.s32 0, %v1223_v52  ;;  %v722_v48 = vld [vmem:[#allocation6 + $0x3e8] sm:$0xff] }
  0x97   :  { %463 = vmatprep.subr.mxu0 %v370_v58  ;;  %601 = vmatpush2.msra.mxu1 %v530_v49  ;;  %v523_v58 = vld [vmem:[#allocation7 + $0x158] sm:$0xff]  ;;  %v721_v49 = vld [vmem:[#allocation6 + $0x3e0] sm:$0xff] }
  0x98   :  { %464 = vmatpush2.msra.mxu0 %v369_v59  ;;  %602 = vmatprep.subr.mxu1 %v529_v50  ;;  %v1231_v59 = vld [vmem:[%s1282_s2] sm:$0xf] }
  0x99   :  { %465 = vmatprep.subr.mxu0 %v368_v60  ;;  %603 = vmatpush2.msra.mxu1 %v528_v51  ;;  %v1234_v60 = vsub.s32 1, %v1223_v52  ;;  %v180_v15 = vrot.slane %v1231_v59, %v179_v10  ;;  %v720_v50 = vld [vmem:[#allocation6 + $0x3d8] sm:$0xff]  ;;  %v719_v51 = vld [vmem:[#allocation6 + $0x3d0] sm:$0xff]  ;;  %v701_v10 = vld [vmem:[#allocation6 + $0x340] sm:$0xff] }
  0x9a   :  { %466 = vmatpush2.msra.mxu0 %v367_v61  ;;  %604 = vmatprep.subr.mxu1 %v527_v53  ;;  %v522_v61 = vld [vmem:[#allocation7 + $0x150] sm:$0xff]  ;;  %v718_v53 = vld [vmem:[#allocation6 + $0x3c8] sm:$0xff] }
  0x9b   :  { %467 = vmatprep.subr.mxu0 %v366_v62  ;;  %605 = vmatpush2.msra.mxu1 %v526_v54  ;;  %v521_v62 = vld [vmem:[#allocation7 + $0x148] sm:$0xff]  ;;  %v717_v54 = vld [vmem:[#allocation6 + $0x3c0] sm:$0xff] }
  0x9c   :  { %468 = vmatpush2.msra.mxu0 %v365_v63  ;;  %606 = vmatprep.subr.mxu1 %v525_v55  ;;  %v520_v63 = vld [vmem:[#allocation7 + $0x140] sm:$0xff]  ;;  %v716_v55 = vld [vmem:[#allocation6 + $0x3b8] sm:$0xff] }
  0x9d   :  { %469 = vmatprep.subr.mxu0 %v364_v0  ;;  %607 = vmatpush2.msra.mxu1 %v524_v56  ;;  %v168_v0 = vrot.slane %v1231_v59, %v1226_v57  ;;  %v715_v56 = vld [vmem:[#allocation6 + $0x3b0] sm:$0xff] }
  0x9e   :  { %470 = vmatpush2.msra.mxu0 %v363_v1  ;;  %608 = vmatprep.subr.mxu1 %v523_v58  ;;  %v519_v1 = vld [vmem:[#allocation7 + $0x138] sm:$0xff]  ;;  %v714_v58 = vld [vmem:[#allocation6 + $0x3a8] sm:$0xff] }
  0x9f   :  { %738 = vmatprep.subr.mxu0 %v692_v2  ;;  %609 = vmatpush2.msra.mxu1 %v522_v61  ;;  %v172_v2 = vrot.slane %v1231_v59, %v1234_v60  ;;  %v713_v61 = vld [vmem:[#allocation6 + $0x3a0] sm:$0xff] }
  0xa0   :  { %610 = vmatprep.subr.mxu1 %v521_v62  ;;  %v712_v62 = vld [vmem:[#allocation6 + $0x398] sm:$0xff] }
  0xa1   :  { %611 = vmatpush2.msra.mxu1 %v520_v63  ;;  %v711_v63 = vld [vmem:[#allocation6 + $0x390] sm:$0xff] }
  0xa2   :  { %612 = vmatprep.subr.mxu1 %v519_v1  ;;  %v709_v1 = vld [vmem:[#allocation6 + $0x380] sm:$0xff] }
 0x11f   :  { %v251_v3 = vpop.f32.mrf.mxu0 }
 0x120   :  { %v252_v4 = vadd.f32 %v251_v3, %v168_v0  ;;  %v1242_v17 = vpop.f32.mrf.mxu1  ;;  %v710_v0 = vld [vmem:[#allocation6 + $0x388] sm:$0xff]  ;;  %v707_v3 = vld [vmem:[#allocation6 + $0x370] sm:$0xff] }
 0x121   :  { %v253_v5 = vpop.f32.mrf.mxu0 }
 0x122   :  { %v254_v6 = vadd.f32 %v253_v5, %v172_v2  ;;  %v327_v8 = vmax.f32 %v252_v4, 0.0  ;;  %v324_v20 = vpop.f32.mrf.mxu1  ;;  %v708_v2 = vld [vmem:[#allocation6 + $0x378] sm:$0xff]  ;;  %v706_v4 = vld [vmem:[#allocation6 + $0x368] sm:$0xff]  ;;  %v705_v5 = vld [vmem:[#allocation6 + $0x360] sm:$0xff] }
 0x123   :  { %v325_v22 = vadd.f32 %v324_v20, %v180_v15  ;;  %v697_v15 = vld [vmem:[#allocation6 + $0x320] sm:$0xff] }
 0x124   :  { %v328_v7 = vmax.f32 %v254_v6, 0.0  ;;  %v704_v6 = vld [vmem:[#allocation6 + $0x358] sm:$0xff]  ;;  %v693_v20 = vld [vmem:[#allocation6 + $0x300] sm:$0xff] }
 0x125   :  { %v330_v25 = vmax.f32 %v325_v22, 0.0  ;;  %v517_v22 = vld [vmem:[#allocation7 + $0x128] sm:$0xff] }
 0x126   :  { %471 = vmatprep.mubr.f32.mxu0 %v328_v7  ;;  %v703_v7 = vld [vmem:[#allocation6 + $0x350] sm:$0xff] }
 0x127   :  { %472 = vmatmul.mubr.f32.vlgmr.msra.gmra.mxu0 %v327_v8  ;;  %v175_v8 = vsub.s32 2, %v1223_v52  ;;  %v695_v52 = vld [vmem:[#allocation6 + $0x310] sm:$0xff] }
 0x128   :  { %739 = vmatpush1.msra.mxu0 %v691_v9  ;;  %802 = vmatprep.mubr.f32.mxu0 %v330_v25  ;;  %v702_v9 = vld [vmem:[#allocation6 + $0x348] sm:$0xff] }
 0x129   :  { %740 = vmatprep.subr.mxu0 %v690_v11  ;;  %v700_v11 = vld [vmem:[#allocation6 + $0x338] sm:$0xff]  ;;  %v513_v25 = vld [vmem:[#allocation7 + $0x108] sm:$0xff] }
 0x12a   :  { %741 = vmatpush1.msra.mxu0 %v689_v12  ;;  %v176_v12 = vrot.slane %v1231_v59, %v175_v8  ;;  %v518_v59 = vld [vmem:[#allocation7 + $0x130] sm:$0xff]  ;;  %v875_v8 = vld [vmem:[#allocation7 + $0x3f8] sm:$0xff] }
 0x12b   :  { %742 = vmatprep.subr.mxu0 %v688_v13  ;;  %v699_v13 = vld [vmem:[#allocation6 + $0x330] sm:$0xff]  ;;  %613 = vmatpush2.msra.mxu1 %v518_v59  ;;  %v861_v59 = vld [vmem:[#allocation7 + $0x388] sm:$0xff] }
 0x12c   :  { %743 = vmatpush1.msra.mxu0 %v687_v14  ;;  %v698_v14 = vld [vmem:[#allocation6 + $0x328] sm:$0xff]  ;;  %614 = vmatprep.subr.mxu1 %v517_v22  ;;  %v860_v22 = vld [vmem:[#allocation7 + $0x380] sm:$0xff] }
 0x12d   :  { %744 = vmatprep.subr.mxu0 %v686_v16  ;;  %v696_v16 = vld [vmem:[#allocation6 + $0x318] sm:$0xff] }
 0x12e   :  { %745 = vmatpush1.msra.mxu0 %v685_v18  ;;  %v323_v18 = vadd.f32 %v1242_v17, %v176_v12  ;;  %v514_v17 = vld [vmem:[#allocation7 + $0x110] sm:$0xff]  ;;  %v871_v12 = vld [vmem:[#allocation7 + $0x3d8] sm:$0xff] }
 0x12f   :  { %746 = vmatprep.subr.mxu0 %v684_v19  ;;  %v694_v19 = vld [vmem:[#allocation6 + $0x308] sm:$0xff] }
 0x130   :  { %747 = vmatpush1.msra.mxu0 %v683_v21  ;;  %v329_v21 = vmax.f32 %v323_v18, 0.0  ;;  %v866_v18 = vld [vmem:[#allocation7 + $0x3b0] sm:$0xff] }
 0x131   :  { %748 = vmatprep.subr.mxu0 %v682_v23  ;;  %v516_v23 = vld [vmem:[#allocation7 + $0x120] sm:$0xff] }
 0x132   :  { %749 = vmatpush1.msra.mxu0 %v681_v24  ;;  %615 = vmatpush2.msra.mxu1 %v516_v23  ;;  %v515_v24 = vld [vmem:[#allocation7 + $0x118] sm:$0xff] }
 0x133   :  { %750 = vmatprep.subr.mxu0 %v680_v26  ;;  %616 = vmatprep.subr.mxu1 %v515_v24  ;;  %v512_v26 = vld [vmem:[#allocation7 + $0x100] sm:$0xff]  ;;  %v859_v23 = vld [vmem:[#allocation7 + $0x378] sm:$0xff]  ;;  %v858_v24 = vld [vmem:[#allocation7 + $0x370] sm:$0xff] }
 0x134   :  { %751 = vmatpush1.msra.mxu0 %v679_v27  ;;  %617 = vmatpush2.msra.mxu1 %v514_v17  ;;  %v843_v27 = vld [vmem:[#allocation7 + $0x2f8] sm:$0xff]  ;;  %v857_v17 = vld [vmem:[#allocation7 + $0x368] sm:$0xff] }
 0x135   :  { %752 = vmatprep.subr.mxu0 %v678_v28  ;;  %618 = vmatprep.subr.mxu1 %v513_v25  ;;  %v395_v28 = vld [vmem:[%s1284_s4] sm:$0x3]  ;;  %v856_v25 = vld [vmem:[#allocation7 + $0x360] sm:$0xff] }
 0x136   :  { %753 = vmatpush1.msra.mxu0 %v677_v29  ;;  %619 = vmatpush2.msra.mxu1 %v512_v26  ;;  %v400_v29 = vrot.slane %v395_v28, %v1226_v57  ;;  %v855_v26 = vld [vmem:[#allocation7 + $0x358] sm:$0xff] }
 0x137   :  { %754 = vmatprep.subr.mxu0 %v676_v30  ;;  %889 = vmatprep.subr.mxu1 %v843_v27  ;;  %v404_v30 = vrot.slane %v395_v28, %v1234_v60  ;;  %v854_v27 = vld [vmem:[#allocation7 + $0x350] sm:$0xff]  ;;  %v853_v28 = vld [vmem:[#allocation7 + $0x348] sm:$0xff] }
 0x138   :  { %755 = vmatpush1.msra.mxu0 %v675_v31 }
 0x139   :  { %756 = vmatprep.subr.mxu0 %v674_v32 }
 0x13a   :  { %757 = vmatpush1.msra.mxu0 %v673_v33 }
 0x13b   :  { %758 = vmatprep.subr.mxu0 %v672_v34 }
 0x13c   :  { %759 = vmatpush1.msra.mxu0 %v671_v35 }
 0x13d   :  { %760 = vmatprep.subr.mxu0 %v670_v36 }
 0x13e   :  { %761 = vmatpush1.msra.mxu0 %v669_v37  ;;  %v842_v37 = vld [vmem:[#allocation7 + $0x2f0] sm:$0xff] }
 0x13f   :  { %762 = vmatprep.subr.mxu0 %v668_v38  ;;  %v841_v38 = vld [vmem:[#allocation7 + $0x2e8] sm:$0xff] }
 0x140   :  { %763 = vmatpush1.msra.mxu0 %v667_v39  ;;  %v840_v39 = vld [vmem:[#allocation7 + $0x2e0] sm:$0xff] }
 0x141   :  { %764 = vmatprep.subr.mxu0 %v666_v40  ;;  %v839_v40 = vld [vmem:[#allocation7 + $0x2d8] sm:$0xff] }
 0x142   :  { %765 = vmatpush1.msra.mxu0 %v665_v41  ;;  %v838_v41 = vld [vmem:[#allocation7 + $0x2d0] sm:$0xff] }
 0x143   :  { %766 = vmatprep.subr.mxu0 %v664_v42  ;;  %v837_v42 = vld [vmem:[#allocation7 + $0x2c8] sm:$0xff] }
 0x144   :  { %767 = vmatpush1.msra.mxu0 %v663_v43  ;;  %v836_v43 = vld [vmem:[#allocation7 + $0x2c0] sm:$0xff] }
 0x145   :  { %768 = vmatprep.subr.mxu0 %v662_v44  ;;  %v835_v44 = vld [vmem:[#allocation7 + $0x2b8] sm:$0xff] }
 0x146   :  { %769 = vmatpush1.msra.mxu0 %v661_v45  ;;  %v834_v45 = vld [vmem:[#allocation7 + $0x2b0] sm:$0xff] }
 0x147   :  { %770 = vmatprep.subr.mxu0 %v724_v46  ;;  %v833_v46 = vld [vmem:[#allocation7 + $0x2a8] sm:$0xff] }
 0x148   :  { %771 = vmatpush2.msra.mxu0 %v723_v47  ;;  %v832_v47 = vld [vmem:[#allocation7 + $0x2a0] sm:$0xff] }
 0x149   :  { %772 = vmatprep.subr.mxu0 %v722_v48  ;;  %v831_v48 = vld [vmem:[#allocation7 + $0x298] sm:$0xff] }
 0x14a   :  { %773 = vmatpush2.msra.mxu0 %v721_v49  ;;  %v830_v49 = vld [vmem:[#allocation7 + $0x290] sm:$0xff] }
 0x14b   :  { %774 = vmatprep.subr.mxu0 %v720_v50  ;;  %v829_v50 = vld [vmem:[#allocation7 + $0x288] sm:$0xff] }
 0x14c   :  { %775 = vmatpush2.msra.mxu0 %v719_v51  ;;  %v828_v51 = vld [vmem:[#allocation7 + $0x280] sm:$0xff] }
 0x14d   :  { %776 = vmatprep.subr.mxu0 %v718_v53  ;;  %v827_v53 = vld [vmem:[#allocation7 + $0x278] sm:$0xff] }
 0x14e   :  { %777 = vmatpush2.msra.mxu0 %v717_v54  ;;  %v826_v54 = vld [vmem:[#allocation7 + $0x270] sm:$0xff] }
 0x14f   :  { %778 = vmatprep.subr.mxu0 %v716_v55  ;;  %v825_v55 = vld [vmem:[#allocation7 + $0x268] sm:$0xff] }
 0x150   :  { %779 = vmatpush2.msra.mxu0 %v715_v56  ;;  %v824_v56 = vld [vmem:[#allocation7 + $0x260] sm:$0xff] }
 0x151   :  { %780 = vmatprep.subr.mxu0 %v714_v58  ;;  %v823_v58 = vld [vmem:[#allocation7 + $0x258] sm:$0xff] }
 0x152   :  { %781 = vmatpush2.msra.mxu0 %v713_v61  ;;  %v822_v61 = vld [vmem:[#allocation7 + $0x250] sm:$0xff] }
 0x153   :  { %782 = vmatprep.subr.mxu0 %v712_v62  ;;  %v821_v62 = vld [vmem:[#allocation7 + $0x248] sm:$0xff] }
 0x154   :  { %783 = vmatpush2.msra.mxu0 %v711_v63  ;;  %v820_v63 = vld [vmem:[#allocation7 + $0x240] sm:$0xff] }
 0x155   :  { %784 = vmatprep.subr.mxu0 %v710_v0  ;;  %v819_v0 = vld [vmem:[#allocation7 + $0x238] sm:$0xff] }
 0x156   :  { %785 = vmatpush2.msra.mxu0 %v709_v1  ;;  %v818_v1 = vld [vmem:[#allocation7 + $0x230] sm:$0xff] }
 0x157   :  { %786 = vmatprep.subr.mxu0 %v708_v2  ;;  %v817_v2 = vld [vmem:[#allocation7 + $0x228] sm:$0xff] }
 0x158   :  { %787 = vmatpush2.msra.mxu0 %v707_v3  ;;  %v816_v3 = vld [vmem:[#allocation7 + $0x220] sm:$0xff] }
 0x159   :  { %788 = vmatprep.subr.mxu0 %v706_v4  ;;  %v815_v4 = vld [vmem:[#allocation7 + $0x218] sm:$0xff] }
 0x15a   :  { %789 = vmatpush2.msra.mxu0 %v705_v5  ;;  %v814_v5 = vld [vmem:[#allocation7 + $0x210] sm:$0xff] }
 0x15b   :  { %790 = vmatprep.subr.mxu0 %v704_v6  ;;  %v813_v6 = vld [vmem:[#allocation7 + $0x208] sm:$0xff] }
 0x15c   :  { %791 = vmatpush2.msra.mxu0 %v703_v7  ;;  %v812_v7 = vld [vmem:[#allocation7 + $0x200] sm:$0xff] }
 0x15d   :  { %792 = vmatprep.subr.mxu0 %v702_v9  ;;  %v874_v9 = vld [vmem:[#allocation7 + $0x3f0] sm:$0xff] }
 0x15e   :  { %793 = vmatpush2.msra.mxu0 %v701_v10  ;;  %v873_v10 = vld [vmem:[#allocation7 + $0x3e8] sm:$0xff] }
 0x15f   :  { %794 = vmatprep.subr.mxu0 %v700_v11  ;;  %v872_v11 = vld [vmem:[#allocation7 + $0x3e0] sm:$0xff] }
 0x160   :  { %795 = vmatpush2.msra.mxu0 %v699_v13  ;;  %v870_v13 = vld [vmem:[#allocation7 + $0x3d0] sm:$0xff] }
 0x161   :  { %796 = vmatprep.subr.mxu0 %v698_v14  ;;  %v869_v14 = vld [vmem:[#allocation7 + $0x3c8] sm:$0xff] }
 0x162   :  { %797 = vmatpush2.msra.mxu0 %v697_v15  ;;  %v868_v15 = vld [vmem:[#allocation7 + $0x3c0] sm:$0xff] }
 0x163   :  { %798 = vmatprep.subr.mxu0 %v696_v16  ;;  %v867_v16 = vld [vmem:[#allocation7 + $0x3b8] sm:$0xff] }
 0x164   :  { %799 = vmatpush2.msra.mxu0 %v695_v52  ;;  %v865_v52 = vld [vmem:[#allocation7 + $0x3a8] sm:$0xff] }
 0x165   :  { %800 = vmatprep.subr.mxu0 %v694_v19  ;;  %v864_v19 = vld [vmem:[#allocation7 + $0x3a0] sm:$0xff] }
 0x166   :  { %801 = vmatpush2.msra.mxu0 %v693_v20  ;;  %v863_v20 = vld [vmem:[#allocation7 + $0x398] sm:$0xff] }
 0x167   :  { %803 = vmatmul.mubr.f32.vlgmr.msra.gmra.mxu0 %v329_v21  ;;  %v862_v21 = vld [vmem:[#allocation7 + $0x390] sm:$0xff] }
 0x1e7   :  { %v473_v31 = vpop.f32.mrf.mxu0 }
 0x1e8   :  { %v474_v32 = vadd.f32 %v473_v31, %v400_v29  ;;  %v1012_v29 = vld [vmem:[%s1284_s4 + $0x2] sm:$0x3] }
 0x1e9   :  { %v475_v33 = vpop.f32.mrf.mxu0  ;;  %v851_v31 = vld [vmem:[#allocation7 + $0x338] sm:$0xff] }
 0x1ea   :  { %v476_v34 = vadd.f32 %v475_v33, %v404_v30  ;;  %v478_v36 = vmax.f32 %v474_v32, 0.0  ;;  %v852_v30 = vld [vmem:[#allocation7 + $0x340] sm:$0xff]  ;;  %v731_v32 = vrot.slane %v1012_v29, %v1226_v57  ;;  %v850_v33 = vld [vmem:[#allocation7 + $0x330] sm:$0xff] }
 0x1ec   :  { %v479_v35 = vmax.f32 %v476_v34, 0.0  ;;  %v735_v34 = vrot.slane %v1012_v29, %v1234_v60 }
 0x1ee   :  { %620 = vmatprep.mubr.f32.mxu1 %v479_v35  ;;  %v849_v35 = vld [vmem:[#allocation7 + $0x328] sm:$0xff] }
 0x1ef   :  { %621 = vmatmul.mubr.f32.vlgmr.msra.gmra.mxu1 %v478_v36 }
 0x1f0   :  { %890 = vmatpush1.msra.mxu1 %v842_v37  ;;  %v848_v37 = vld [vmem:[#allocation7 + $0x320] sm:$0xff] }
 0x1f1   :  { %891 = vmatprep.subr.mxu1 %v841_v38  ;;  %v847_v38 = vld [vmem:[#allocation7 + $0x318] sm:$0xff] }
 0x1f2   :  { %892 = vmatpush1.msra.mxu1 %v840_v39 }
 0x1f3   :  { %893 = vmatprep.subr.mxu1 %v839_v40 }
 0x1f4   :  { %894 = vmatpush1.msra.mxu1 %v838_v41  ;;  %v846_v41 = vld [vmem:[#allocation7 + $0x310] sm:$0xff] }
 0x1f5   :  { %895 = vmatprep.subr.mxu1 %v837_v42 }
 0x1f6   :  { %896 = vmatpush1.msra.mxu1 %v836_v43  ;;  %v845_v43 = vld [vmem:[#allocation7 + $0x308] sm:$0xff] }
 0x1f7   :  { %897 = vmatprep.subr.mxu1 %v835_v44  ;;  %v844_v44 = vld [vmem:[#allocation7 + $0x300] sm:$0xff] }
 0x1f8   :  { %898 = vmatpush1.msra.mxu1 %v834_v45 }
 0x1f9   :  { %899 = vmatprep.subr.mxu1 %v833_v46 }
 0x1fa   :  { %900 = vmatpush1.msra.mxu1 %v832_v47 }
 0x1fb   :  { %901 = vmatprep.subr.mxu1 %v831_v48  ;;  %v1013_v48 = vld [vmem:[%s1286_s6 + $0x2] sm:$0x3] }
 0x1fc   :  { %902 = vmatpush1.msra.mxu1 %v830_v49  ;;  %v544_v49 = vld [vmem:[%s1286_s6] sm:$0x3] }
 0x1fd   :  { %903 = vmatprep.subr.mxu1 %v829_v50  ;;  %v553_v50 = vrot.slane %v544_v49, %v1234_v60 }
 0x1fe   :  { %904 = vmatpush1.msra.mxu1 %v828_v51  ;;  %v882_v51 = vrot.slane %v1013_v48, %v1226_v57 }
 0x1ff   :  { %905 = vmatprep.subr.mxu1 %v827_v53 }
 0x200   :  { %906 = vmatpush1.msra.mxu1 %v826_v54  ;;  %v549_v54 = vrot.slane %v544_v49, %v1226_v57 }
 0x201   :  { %907 = vmatprep.subr.mxu1 %v825_v55  ;;  %v886_v55 = vrot.slane %v1013_v48, %v1234_v60 }
 0x202   :  { %908 = vmatpush1.msra.mxu1 %v824_v56  ;;  %v963_v56 = vld [vmem:[#allocation9 + $0x2] sm:$0x3] }
 0x203   :  { %909 = vmatprep.subr.mxu1 %v823_v58 }
 0x204   :  { %910 = vmatpush1.msra.mxu1 %v822_v61 }
 0x205   :  { %911 = vmatprep.subr.mxu1 %v821_v62 }
 0x206   :  { %912 = vmatpush1.msra.mxu1 %v820_v63 }
 0x207   :  { %913 = vmatprep.subr.mxu1 %v819_v0  ;;  %v968_v0 = vrot.slane %v963_v56, %v1226_v57 }
 0x208   :  { %914 = vmatpush1.msra.mxu1 %v818_v1 }
 0x209   :  { %915 = vmatprep.subr.mxu1 %v817_v2 }
 0x20a   :  { %916 = vmatpush1.msra.mxu1 %v816_v3 }
 0x20b   :  { %917 = vmatprep.subr.mxu1 %v815_v4  ;;  %v972_v4 = vrot.slane %v963_v56, %v1234_v60 }
 0x20c   :  { %918 = vmatpush1.msra.mxu1 %v814_v5  ;;  %v629_v5 = vld [vmem:[#allocation9] sm:$0x3] }
 0x20d   :  { %919 = vmatprep.subr.mxu1 %v813_v6 }
 0x20e   :  { %920 = vmatpush1.msra.mxu1 %v812_v7  ;;  %v638_v7 = vrot.slane %v629_v5, %v1234_v60 }
 0x20f   :  { %921 = vmatprep.subr.mxu1 %v875_v8 }
 0x210   :  { %922 = vmatpush2.msra.mxu1 %v874_v9 }
 0x211   :  { %923 = vmatprep.subr.mxu1 %v873_v10  ;;  %v634_v10 = vrot.slane %v629_v5, %v1226_v57 }
 0x212   :  { %924 = vmatpush2.msra.mxu1 %v872_v11 }
 0x213   :  { %925 = vmatprep.subr.mxu1 %v871_v12 }
 0x214   :  { %926 = vmatpush2.msra.mxu1 %v870_v13 }
 0x215   :  { %927 = vmatprep.subr.mxu1 %v869_v14 }
 0x216   :  { %928 = vmatpush2.msra.mxu1 %v868_v15 }
 0x217   :  { %929 = vmatprep.subr.mxu1 %v867_v16 }
 0x218   :  { %930 = vmatpush2.msra.mxu1 %v866_v18  ;;  %v1015_v18 = vld [vmem:[%s1288_s8 + $0x1] ss:$0 sm:$0xff] }
 0x219   :  { %931 = vmatprep.subr.mxu1 %v865_v52 }
 0x21a   :  { %932 = vmatpush2.msra.mxu1 %v864_v19 }
 0x21b   :  { %933 = vmatprep.subr.mxu1 %v863_v20 }
 0x21c   :  { %934 = vmatpush2.msra.mxu1 %v862_v21 }
 0x21d   :  { %935 = vmatprep.subr.mxu1 %v861_v59  ;;  %v1010_v59 = vld [vmem:[%s1288_s8] ss:$0 sm:$0xff] }
 0x21e   :  { %936 = vmatpush2.msra.mxu1 %v860_v22 }
 0x21f   :  { %937 = vmatprep.subr.mxu1 %v859_v23 }
 0x220   :  { %938 = vmatpush2.msra.mxu1 %v858_v24 }
 0x221   :  { %939 = vmatprep.subr.mxu1 %v857_v17 }
 0x222   :  { %940 = vmatpush2.msra.mxu1 %v856_v25 }
 0x223   :  { %941 = vmatprep.subr.mxu1 %v855_v26 }
 0x224   :  { %942 = vmatpush2.msra.mxu1 %v854_v27 }
 0x225   :  { %943 = vmatprep.subr.mxu1 %v853_v28 }
 0x226   :  { %944 = vmatpush2.msra.mxu1 %v852_v30 }
 0x227   :  { %v804_v36 = vpop.f32.mrf.mxu0  ;;  %945 = vmatprep.subr.mxu1 %v851_v31 }
 0x228   :  { %946 = vmatpush2.msra.mxu1 %v850_v33  ;;  %v805_v39 = vadd.f32 %v804_v36, %v731_v32 }
 0x229   :  { %v806_v40 = vpop.f32.mrf.mxu0  ;;  %947 = vmatprep.subr.mxu1 %v849_v35 }
 0x22a   :  { %v807_v42 = vadd.f32 %v806_v40, %v735_v34  ;;  %948 = vmatpush2.msra.mxu1 %v848_v37  ;;  %v809_v46 = vmax.f32 %v805_v39, 0.0 }
 0x22b   :  { %949 = vmatprep.subr.mxu1 %v847_v38 }
 0x22c   :  { %v810_v45 = vmax.f32 %v807_v42, 0.0  ;;  %950 = vmatpush2.msra.mxu1 %v846_v41 }
 0x22d   :  { %951 = vmatprep.subr.mxu1 %v845_v43 }
 0x22e   :  { %952 = vmatpush2.msra.mxu1 %v844_v44  ;;  %953 = vmatprep.mubr.f32.mxu1 %v810_v45 }
 0x22f   :  { %954 = vmatmul.mubr.f32.vlgmr.msra.gmra.mxu1 %v809_v46 }
 0x2af   :  { %v622_v47 = vpop.f32.mrf.mxu1 }
 0x2b0   :  { %v623_v1 = vadd.f32 %v622_v47, %v549_v54 }
 0x2b1   :  { %v624_v53 = vpop.f32.mrf.mxu1 }
 0x2b2   :  { %v625_v61 = vadd.f32 %v624_v53, %v553_v50  ;;  %v627_v9 = vmax.f32 %v623_v1, 0.0 }
 0x2b4   :  { %v628_v6 = vmax.f32 %v625_v61, 0.0  ;;  %v641_v15 = vmul.f32 %v634_v10, %v627_v9 }
 0x2b6   :  { %v642_v13 = vmul.f32 %v638_v7, %v628_v6 }
 0x2b8   :  { %v643_v16 = vadd.f32 %v642_v13, %v641_v15 }
 0x2ef   :  { %v955_v58 = vpop.f32.mrf.mxu1 }
 0x2f0   :  { %v956_v62 = vadd.f32 %v955_v58, %v882_v51 }
 0x2f1   :  { %v957_v63 = vpop.f32.mrf.mxu1 }
 0x2f2   :  { %v960_v2 = vmax.f32 %v956_v62, 0.0  ;;  %v958_v3 = vadd.f32 %v957_v63, %v886_v55 }
 0x2f4   :  { %v961_v8 = vmax.f32 %v958_v3, 0.0  ;;  %v975_v11 = vmul.f32 %v968_v0, %v960_v2 }
 0x2f6   :  { %v976_v12 = vmul.f32 %v972_v4, %v961_v8 }
 0x2f8   :  { %v977_v14 = vadd.f32 %v976_v12, %v975_v11 }
 0x2fa   :  { %978 = vadd.xlane.f32.xlu0 %v977_v14 }
 0x2fe   :  { %644 = vadd.xlane.f32.xlu0 %v643_v16 }
 0x383   :  { %v979_v52 = vpop.xlane.xlu0 %978 }
 0x384   :  { %v988_v19 = vadd.f32 %v1015_v18, %v979_v52 }
 0x386   :  { %v1016_v20 = vmul.f32 -1.442695, %v988_v19 }
 0x387   :  { %v645_v22 = vpop.xlane.xlu0 %644 }
 0x388   :  { %1029 = vpow2.f32 %v1016_v20  ;;  %v653_v23 = vadd.f32 %v1010_v59, %v645_v22 }
 0x38a   :  { %v1011_v24 = vmul.f32 -1.442695, %v653_v23 }
 0x395   :  { %v1030_v60 = vpop.eup %1029 }
 0x396   :  { %v992_v21 = vadd.f32 1.0, %v1030_v60 }
 0x398   :  { %1031 = vrcp.f32 %v992_v21 }
 0x399   :  { %1033 = vpow2.f32 %v1011_v24 }
 0x3a5   :  { %v1032_v57 = vpop.eup %1031 }
 0x3a6   :  { %996 = vrot.lane.b32.xlu1 %v1032_v57, %s1154_s22  ;;  %v1034_v17 = vpop.eup %1033 }
 0x3a7   :  { %v657_v25 = vadd.f32 1.0, %v1034_v17 }
 0x3a9   :  { %1035 = vrcp.f32 %v657_v25 }
 0x3b6   :  { %v1036_v26 = vpop.eup %1035 }
 0x418   :  { %v997_v27 = vpop.permute.xlu1 %996 }
 0x419   :  { %v1000_v28 = vsel %vm999_vm0, %v1036_v26, %v997_v27 }
 0x41a   :  { %1002 = vst.msk [vmem:[%s1289_s9] sm:$0xff] %vm1001_vm1, %v1000_v28 }
 0x41b   :  { %1007 = vsyncpa [#allocation3], 1 }
 0x41c   :  { %1008 = vsyncpa [#allocation5], 1 }
 0x41d   :  { %1009 = vsyncpa [#allocation8], 1 }

</bundles_post_ra>
